<compile_context>
chip_gen: v6e
topology: v6e:2x2x1
jax: 0.10.0
libtpu: 0.0.40
codegen_flags: <defaults>
</compile_context>

<pallas_src>
import math
import functools

import jax
import jax.numpy as jnp
from jax import lax
from jax.experimental import pallas as pl
from jax.experimental.pallas import tpu as pltpu

LN_EPS = 1e-5  # torch.nn.LayerNorm default eps


def _layernorm(x, w, b):
    mu = jnp.mean(x, axis=-1, keepdims=True)
    var = jnp.mean((x - mu) ** 2, axis=-1, keepdims=True)
    return (x - mu) * lax.rsqrt(var + LN_EPS) * w + b


# ---------------------------------------------------------------------------
# Fused whole-transformer kernel (grid = (batch, depth))
# ---------------------------------------------------------------------------
def transformer_kernel(x_ref, ln1w_ref, ln1b_ref, wqkv_ref, wout_ref,
                       bout_ref, ln2w_ref, ln2b_ref, w1_ref, b1_ref,
                       w2_ref, b2_ref, o_ref, res_ref, *, heads, dim_head):
    f32 = jnp.float32
    bf16 = jnp.bfloat16
    layer = pl.program_id(1)

    # Load the batch tile into the resident VMEM residual stream at layer 0.
    @pl.when(layer == 0)
    def _():
        res_ref[...] = x_ref[0].astype(f32)

    x = res_ref[...]                                        # (N, D) f32
    n, d = x.shape

    # ----------------- attention block: PreNorm -> MHSA -> +x -----------------
    xn = _layernorm(x, ln1w_ref[0], ln1b_ref[0]).astype(bf16)        # (N, D)

    # Head-major batched QKV projection: weights are (3H, D, dh) bf16.
    xb = jnp.broadcast_to(xn[None], (3 * heads, n, d))               # (3H, N, D)
    qkv = jnp.einsum("gnd,gdc->gnc", xb, wqkv_ref[0],
                     preferred_element_type=f32).astype(bf16)        # (3H, N, dh)
    q = qkv[0 * heads:1 * heads]                                     # (H, N, dh)
    k = qkv[1 * heads:2 * heads]
    v = qkv[2 * heads:3 * heads]

    scale = dim_head ** (-0.5)
    dots = jnp.einsum("hqc,hkc->hqk", q, k,
                      preferred_element_type=f32) * scale            # (H, N, N) f32
    dots = dots - jnp.max(dots, axis=-1, keepdims=True)
    e = jnp.exp(dots)
    attn = e * pl.reciprocal(jnp.sum(e, axis=-1, keepdims=True), approx=True)

    out_h = jnp.einsum("hqk,hkc->hqc", attn.astype(bf16), v,
                       preferred_element_type=f32)                   # (H, N, dh)
    # Output projection with head-major W_out (H, dh, D): batched matmul then
    # reduce over heads (no lane-dim concatenate needed).
    proj_h = jnp.einsum("hnc,hcd->hnd", out_h.astype(bf16), wout_ref[0],
                        preferred_element_type=f32)                  # (H, N, D)
    x = jnp.sum(proj_h, axis=0) + bout_ref[0] + x                    # residual 1

    # ----------------- feed-forward block: PreNorm -> MLP -> +x ---------------
    xn2 = _layernorm(x, ln2w_ref[0], ln2b_ref[0]).astype(bf16)
    h = jnp.dot(xn2, w1_ref[0], preferred_element_type=f32) + b1_ref[0]
    # exact (erf) GELU, matching torch.nn.GELU default
    h = 0.5 * h * (1.0 + lax.erf(h * (1.0 / math.sqrt(2.0))))
    y = jnp.dot(h.astype(bf16), w2_ref[0],
                preferred_element_type=f32) + b2_ref[0]
    x = y + x                                                        # residual 2

    res_ref[...] = x

    @pl.when(layer == pl.num_programs(1) - 1)
    def _():
        o_ref[0] = x.astype(o_ref.dtype)


# ---------------------------------------------------------------------------
# pallas_call wrapper
# ---------------------------------------------------------------------------
def transformer_forward(x, p, *, heads, dim_head):
    """x: (B, N, D) f32.  p: dict of depth-stacked params (see prepare_params)."""
    B, N, D = x.shape
    depth = p["w1"].shape[0]
    kernel = functools.partial(transformer_kernel, heads=heads, dim_head=dim_head)

    def wspec(arr):
        # One layer's full weight per grid step, streamed along the depth axis.
        shape = arr.shape
        return pl.BlockSpec((1,) + shape[1:],
                            lambda b, l, _n=len(shape): (l,) + (0,) * (_n - 1))

    return pl.pallas_call(
        kernel,
        out_shape=jax.ShapeDtypeStruct((B, N, D), x.dtype),
        grid=(B, depth),
        in_specs=[
            pl.BlockSpec((1, N, D), lambda b, l: (b, 0, 0)),   # x (per-batch tile)
            wspec(p["ln1_w"]),                                 # (depth, 1, D) f32
            wspec(p["ln1_b"]),
            wspec(p["w_qkv_hm"]),                              # (depth, 3H, D, dh) bf16
            wspec(p["w_out_hm"]),                              # (depth, H, dh, D) bf16
            wspec(p["b_out"]),
            wspec(p["ln2_w"]),
            wspec(p["ln2_b"]),
            wspec(p["w1"]),                                    # (depth, D, mlp) bf16
            wspec(p["b1"]),
            wspec(p["w2"]),                                    # (depth, mlp, D) bf16
            wspec(p["b2"]),
        ],
        out_specs=pl.BlockSpec((1, N, D), lambda b, l: (b, 0, 0)),
        scratch_shapes=[pltpu.VMEM((N, D), jnp.float32)],      # resident residual
        compiler_params=pltpu.CompilerParams(
            dimension_semantics=("parallel", "arbitrary"),
            # Ceiling (not a reservation): lets realistic bf16 weight sets fit
            # the scoped-VMEM budget; harmless at these tiny test shapes.
            vmem_limit_bytes=64 * 1024 * 1024,
        ),
    )(x, p["ln1_w"], p["ln1_b"], p["w_qkv_hm"], p["w_out_hm"], p["b_out"],
      p["ln2_w"], p["ln2_b"], p["w1"], p["b1"], p["w2"], p["b2"])


def prepare_params(layers, *, heads, dim_head):
    """Stack per-layer (PyTorch-layout) f32 params along a leading depth axis
    and convert matmul weights to the kernel's bf16 / head-major layout."""
    dim = layers[0]["w_qkv"].shape[0]
    bf16 = jnp.bfloat16

    def stack(key):
        return jnp.stack([l[key] for l in layers], axis=0)

    # (D, 3*inner) with columns [q|k|v], each ordered (h, d)  ->  (3H, D, dh)
    w_qkv_hm = jnp.stack([
        l["w_qkv"].reshape(dim, 3, heads, dim_head)
                  .transpose(1, 2, 0, 3)
                  .reshape(3 * heads, dim, dim_head)
        for l in layers], axis=0).astype(bf16)
    # (inner, D) with rows ordered (h, d)  ->  (H, dh, D)
    w_out_hm = jnp.stack([
        l["w_out"].reshape(heads, dim_head, dim) for l in layers],
        axis=0).astype(bf16)

    return {
        "ln1_w": stack("ln1_w"), "ln1_b": stack("ln1_b"),
        "w_qkv_hm": w_qkv_hm, "w_out_hm": w_out_hm, "b_out": stack("b_out"),
        "ln2_w": stack("ln2_w"), "ln2_b": stack("ln2_b"),
        "w1": stack("w1").astype(bf16), "b1": stack("b1"),
        "w2": stack("w2").astype(bf16), "b2": stack("b2"),
    }


# ---------------------------------------------------------------------------
# Deterministic parameter init + pure-JAX (f32, PyTorch-semantics) reference
# ---------------------------------------------------------------------------
def init_params(key, *, dim, depth, heads, dim_head, mlp_dim):
    inner = heads * dim_head
    layers = []
    for _ in range(depth):
        key, k1, k2, k3, k4, k5, k6, k7, k8 = jax.random.split(key, 9)
        layers.append({
            "ln1_w": 1.0 + 0.1 * jax.random.normal(k7, (1, dim), jnp.float32),
            "ln1_b": 0.05 * jax.random.normal(k8, (1, dim), jnp.float32),
            "w_qkv": 0.05 * jax.random.normal(k1, (dim, 3 * inner), jnp.float32),
            "w_out": 0.05 * jax.random.normal(k2, (inner, dim), jnp.float32),
            "b_out": 0.05 * jax.random.normal(k3, (1, dim), jnp.float32),
            "ln2_w": jnp.ones((1, dim), jnp.float32),
            "ln2_b": jnp.zeros((1, dim), jnp.float32),
            "w1": 0.05 * jax.random.normal(k4, (dim, mlp_dim), jnp.float32),
            "b1": 0.05 * jax.random.normal(k5, (1, mlp_dim), jnp.float32),
            "w2": 0.05 * jax.random.normal(k6, (mlp_dim, dim), jnp.float32),
            "b2": jnp.zeros((1, dim), jnp.float32),
        })
    return layers


def transformer_reference(x, layers, *, heads, dim_head):
    def ln(t, w, b):
        mu = jnp.mean(t, axis=-1, keepdims=True)
        var = jnp.mean((t - mu) ** 2, axis=-1, keepdims=True)
        return (t - mu) / jnp.sqrt(var + LN_EPS) * w + b

    inner = heads * dim_head
    B, N, _ = x.shape
    for p in layers:
        xn = ln(x, p["ln1_w"], p["ln1_b"])
        qkv = xn @ p["w_qkv"]
        q, k, v = jnp.split(qkv, 3, axis=-1)
        q = q.reshape(B, N, heads, dim_head).transpose(0, 2, 1, 3)
        k = k.reshape(B, N, heads, dim_head).transpose(0, 2, 1, 3)
        v = v.reshape(B, N, heads, dim_head).transpose(0, 2, 1, 3)
        dots = jnp.einsum("bhnd,bhmd->bhnm", q, k) * (dim_head ** -0.5)
        attn = jax.nn.softmax(dots, axis=-1)
        out = jnp.einsum("bhnm,bhmd->bhnd", attn, v)
        out = out.transpose(0, 2, 1, 3).reshape(B, N, inner)
        x = out @ p["w_out"] + p["b_out"] + x

        xn = ln(x, p["ln2_w"], p["ln2_b"])
        h = xn @ p["w1"] + p["b1"]
        h = jax.nn.gelu(h, approximate=False)
        x = h @ p["w2"] + p["b2"] + x
    return x


if __name__ == "__main__":
    # Small, module-consistent shapes.
    B, N, DIM = 2, 8, 32
    DEPTH, HEADS, DIM_HEAD, MLP_DIM = 2, 4, 16, 64

    key = jax.random.PRNGKey(0)
    key, xkey = jax.random.split(key)
    x = jax.random.normal(xkey, (B, N, DIM), jnp.float32)

    layers = init_params(key, dim=DIM, depth=DEPTH, heads=HEADS,
                         dim_head=DIM_HEAD, mlp_dim=MLP_DIM)
    params = prepare_params(layers, heads=HEADS, dim_head=DIM_HEAD)

    out = transformer_forward(x, params, heads=HEADS, dim_head=DIM_HEAD)
    out = jax.block_until_ready(out)

    ref = transformer_reference(x, layers, heads=HEADS, dim_head=DIM_HEAD)
    assert out.shape == (B, N, DIM)
    err = float(jnp.max(jnp.abs(out - ref)))
    # Kernel uses bf16 MXU inputs with f32 accumulation; reference is full f32.
    assert err < 2e-2, f"Pallas output mismatch vs reference: {err}"

    print("KERNEL_OK")
</pallas_src>

<mosaic_0001>
module attributes {stable_mosaic.version = 11 : i64} {
  func.func @transformer_kernel(%arg0: i32, %arg1: i32, %arg2: memref<1x8x32xf32, #tpu.memory_space<vmem>>, %arg3: memref<1x1x32xf32, #tpu.memory_space<vmem>>, %arg4: memref<1x1x32xf32, #tpu.memory_space<vmem>>, %arg5: memref<1x12x32x16xbf16, #tpu.memory_space<vmem>>, %arg6: memref<1x4x16x32xbf16, #tpu.memory_space<vmem>>, %arg7: memref<1x1x32xf32, #tpu.memory_space<vmem>>, %arg8: memref<1x1x32xf32, #tpu.memory_space<vmem>>, %arg9: memref<1x1x32xf32, #tpu.memory_space<vmem>>, %arg10: memref<1x32x64xbf16, #tpu.memory_space<vmem>>, %arg11: memref<1x1x64xf32, #tpu.memory_space<vmem>>, %arg12: memref<1x64x32xbf16, #tpu.memory_space<vmem>>, %arg13: memref<1x1x32xf32, #tpu.memory_space<vmem>>, %arg14: memref<1x8x32xf32, #tpu.memory_space<vmem>>, %arg15: memref<8x32xf32, #tpu.memory_space<vmem>>) attributes {dimension_semantics = [#tpu.dimension_semantics<parallel>, #tpu.dimension_semantics<arbitrary>], iteration_bounds = array<i64: 2, 2>, scalar_prefetch = 0 : i64, scratch_operands = 1 : i64, tpu.core_type = #tpu.core_type<tc>, window_params = [{transform_indices = @transform_0, window_bounds = array<i64: 1, 8, 32>}, {transform_indices = @transform_1, window_bounds = array<i64: 1, 1, 32>}, {transform_indices = @transform_2, window_bounds = array<i64: 1, 1, 32>}, {transform_indices = @transform_3, window_bounds = array<i64: 1, 12, 32, 16>}, {transform_indices = @transform_4, window_bounds = array<i64: 1, 4, 16, 32>}, {transform_indices = @transform_5, window_bounds = array<i64: 1, 1, 32>}, {transform_indices = @transform_6, window_bounds = array<i64: 1, 1, 32>}, {transform_indices = @transform_7, window_bounds = array<i64: 1, 1, 32>}, {transform_indices = @transform_8, window_bounds = array<i64: 1, 32, 64>}, {transform_indices = @transform_9, window_bounds = array<i64: 1, 1, 64>}, {transform_indices = @transform_10, window_bounds = array<i64: 1, 64, 32>}, {transform_indices = @transform_11, window_bounds = array<i64: 1, 1, 32>}, {transform_indices = @transform_12, window_bounds = array<i64: 1, 8, 32>}]} {
    %c0_i32 = arith.constant 0 : i32
    %0 = arith.cmpi eq, %arg1, %c0_i32 : i32
    %1 = arith.extui %0 : i1 to i32
    %c0_i32_0 = arith.constant 0 : i32
    %2 = arith.cmpi ne, %1, %c0_i32_0 : i32
    scf.if %2 {
      %c0_62 = arith.constant 0 : index
      %c0_63 = arith.constant 0 : index
      %c0_64 = arith.constant 0 : index
      %121 = vector.load %arg2[%c0_62, %c0_63, %c0_64] : memref<1x8x32xf32, #tpu.memory_space<vmem>>, vector<1x8x32xf32>
      %122 = vector.shape_cast %121 : vector<1x8x32xf32> to vector<8x32xf32>
      %c0_65 = arith.constant 0 : index
      %c0_66 = arith.constant 0 : index
      %123 = vector.load %arg15[%c0_65, %c0_66] : memref<8x32xf32, #tpu.memory_space<vmem>>, vector<8x32xf32>
      tpu.vector_store %arg15[%c0_65, %c0_66], %122 {strides = array<i32>} : memref<8x32xf32, #tpu.memory_space<vmem>>, vector<8x32xf32>,
    } else {
    }
    %c0 = arith.constant 0 : index
    %c0_1 = arith.constant 0 : index
    %3 = vector.load %arg15[%c0, %c0_1] : memref<8x32xf32, #tpu.memory_space<vmem>>, vector<8x32xf32>
    %c0_2 = arith.constant 0 : index
    %c0_3 = arith.constant 0 : index
    %c0_4 = arith.constant 0 : index
    %4 = vector.load %arg3[%c0_2, %c0_3, %c0_4] : memref<1x1x32xf32, #tpu.memory_space<vmem>>, vector<1x1x32xf32>
    %5 = vector.shape_cast %4 : vector<1x1x32xf32> to vector<1x32xf32>
    %c0_5 = arith.constant 0 : index
    %c0_6 = arith.constant 0 : index
    %c0_7 = arith.constant 0 : index
    %6 = vector.load %arg4[%c0_5, %c0_6, %c0_7] : memref<1x1x32xf32, #tpu.memory_space<vmem>>, vector<1x1x32xf32>
    %7 = vector.shape_cast %6 : vector<1x1x32xf32> to vector<1x32xf32>
    %cst = arith.constant dense<0.000000e+00> : vector<8xf32>
    %8 = vector.multi_reduction <add>, %3, %cst [1] : vector<8x32xf32> to vector<8xf32>
    %9 = vector.shape_cast %8 : vector<8xf32> to vector<8x1xf32>
    %cst_8 = arith.constant 3.200000e+01 : f32
    %10 = vector.broadcast %cst_8 : f32 to vector<8x1xf32>
    %11 = arith.divf %9, %10 : vector<8x1xf32>
    %12 = vector.broadcast %11 : vector<8x1xf32> to vector<8x32xf32>
    %13 = arith.subf %3, %12 : vector<8x32xf32>
    %14 = arith.mulf %13, %13 : vector<8x32xf32>
    %cst_9 = arith.constant dense<0.000000e+00> : vector<8xf32>
    %15 = vector.multi_reduction <add>, %14, %cst_9 [1] : vector<8x32xf32> to vector<8xf32>
    %16 = vector.shape_cast %15 : vector<8xf32> to vector<8x1xf32>
    %cst_10 = arith.constant 3.200000e+01 : f32
    %17 = vector.broadcast %cst_10 : f32 to vector<8x1xf32>
    %18 = arith.divf %16, %17 : vector<8x1xf32>
    %19 = vector.broadcast %11 : vector<8x1xf32> to vector<8x32xf32>
    %20 = arith.subf %3, %19 : vector<8x32xf32>
    %cst_11 = arith.constant 9.99999974E-6 : f32
    %21 = vector.broadcast %cst_11 : f32 to vector<8x1xf32>
    %22 = arith.addf %18, %21 : vector<8x1xf32>
    %23 = math.rsqrt %22 : vector<8x1xf32>
    %24 = vector.broadcast %23 : vector<8x1xf32> to vector<8x32xf32>
    %25 = arith.mulf %20, %24 : vector<8x32xf32>
    %26 = vector.broadcast %5 : vector<1x32xf32> to vector<8x32xf32>
    %27 = arith.mulf %25, %26 : vector<8x32xf32>
    %28 = vector.broadcast %7 : vector<1x32xf32> to vector<8x32xf32>
    %29 = arith.addf %27, %28 : vector<8x32xf32>
    %30 = arith.truncf %29 : vector<8x32xf32> to vector<8x32xbf16>
    %31 = vector.shape_cast %30 : vector<8x32xbf16> to vector<1x8x32xbf16>
    %32 = vector.shape_cast %31 : vector<1x8x32xbf16> to vector<1x8x32xbf16>
    %33 = vector.broadcast %32 : vector<1x8x32xbf16> to vector<12x8x32xbf16>
    %c0_12 = arith.constant 0 : index
    %c0_13 = arith.constant 0 : index
    %c0_14 = arith.constant 0 : index
    %c0_15 = arith.constant 0 : index
    %34 = vector.load %arg5[%c0_12, %c0_13, %c0_14, %c0_15] : memref<1x12x32x16xbf16, #tpu.memory_space<vmem>>, vector<1x12x32x16xbf16>
    %35 = vector.shape_cast %34 : vector<1x12x32x16xbf16> to vector<12x32x16xbf16>
    "tpu.trace_start"() <{level = 10 : i32, message = "gnd,gdc->gnc"}> : () -> ()
    %cst_16 = arith.constant dense<0.000000e+00> : vector<12x8x16xf32>
    %36 = tpu.matmul %33, %35, %cst_16 {dimension_numbers = #tpu.dot_dimension_numbers<[2], [1], [1], [2], [0, 0, 0, 1, 1, 2], [0], [0]>} : vector<12x8x32xbf16>, vector<12x32x16xbf16>, vector<12x8x16xf32> -> vector<12x8x16xf32>
    "tpu.trace_stop"() : () -> ()
    %37 = arith.truncf %36 : vector<12x8x16xf32> to vector<12x8x16xbf16>
    %38 = vector.extract_strided_slice %37 {offsets = [0, 0, 0], sizes = [4, 8, 16], strides = [1, 1, 1]} : vector<12x8x16xbf16> to vector<4x8x16xbf16>
    %39 = vector.extract_strided_slice %37 {offsets = [4, 0, 0], sizes = [4, 8, 16], strides = [1, 1, 1]} : vector<12x8x16xbf16> to vector<4x8x16xbf16>
    %40 = vector.extract_strided_slice %37 {offsets = [8, 0, 0], sizes = [4, 8, 16], strides = [1, 1, 1]} : vector<12x8x16xbf16> to vector<4x8x16xbf16>
    "tpu.trace_start"() <{level = 10 : i32, message = "hqc,hkc->hqk"}> : () -> ()
    %cst_17 = arith.constant dense<0.000000e+00> : vector<4x8x8xf32>
    %41 = tpu.matmul %38, %39, %cst_17 {dimension_numbers = #tpu.dot_dimension_numbers<[2], [2], [1], [1], [0, 0, 0, 1, 1, 1], [0], [0]>} : vector<4x8x16xbf16>, vector<4x8x16xbf16>, vector<4x8x8xf32> -> vector<4x8x8xf32>
    "tpu.trace_stop"() : () -> ()
    %cst_18 = arith.constant 2.500000e-01 : f32
    %42 = vector.broadcast %cst_18 : f32 to vector<4x8x8xf32>
    %43 = arith.mulf %41, %42 : vector<4x8x8xf32>
    %cst_19 = arith.constant dense<0xFF800000> : vector<4x8xf32>
    %44 = vector.multi_reduction <maximumf>, %43, %cst_19 [2] : vector<4x8x8xf32> to vector<4x8xf32>
    %45 = vector.shape_cast %44 : vector<4x8xf32> to vector<4x8x1xf32>
    %46 = vector.broadcast %45 : vector<4x8x1xf32> to vector<4x8x8xf32>
    %47 = arith.subf %43, %46 : vector<4x8x8xf32>
    %48 = math.exp %47 : vector<4x8x8xf32>
    %cst_20 = arith.constant dense<0.000000e+00> : vector<4x8xf32>
    %49 = vector.multi_reduction <add>, %48, %cst_20 [2] : vector<4x8x8xf32> to vector<4x8xf32>
    %50 = vector.shape_cast %49 : vector<4x8xf32> to vector<4x8x1xf32>
    %51 = tpu.reciprocal %50 {approx = true} : vector<4x8x1xf32> -> vector<4x8x1xf32>
    %52 = vector.broadcast %51 : vector<4x8x1xf32> to vector<4x8x8xf32>
    %53 = arith.mulf %48, %52 : vector<4x8x8xf32>
    %54 = arith.truncf %53 : vector<4x8x8xf32> to vector<4x8x8xbf16>
    "tpu.trace_start"() <{level = 10 : i32, message = "hqk,hkc->hqc"}> : () -> ()
    %cst_21 = arith.constant dense<0.000000e+00> : vector<4x8x16xf32>
    %55 = tpu.matmul %54, %40, %cst_21 {dimension_numbers = #tpu.dot_dimension_numbers<[2], [1], [1], [2], [0, 0, 0, 1, 1, 2], [0], [0]>} : vector<4x8x8xbf16>, vector<4x8x16xbf16>, vector<4x8x16xf32> -> vector<4x8x16xf32>
    "tpu.trace_stop"() : () -> ()
    %56 = arith.truncf %55 : vector<4x8x16xf32> to vector<4x8x16xbf16>
    %c0_22 = arith.constant 0 : index
    %c0_23 = arith.constant 0 : index
    %c0_24 = arith.constant 0 : index
    %c0_25 = arith.constant 0 : index
    %57 = vector.load %arg6[%c0_22, %c0_23, %c0_24, %c0_25] : memref<1x4x16x32xbf16, #tpu.memory_space<vmem>>, vector<1x4x16x32xbf16>
    %58 = vector.shape_cast %57 : vector<1x4x16x32xbf16> to vector<4x16x32xbf16>
    "tpu.trace_start"() <{level = 10 : i32, message = "hnc,hcd->hnd"}> : () -> ()
    %cst_26 = arith.constant dense<0.000000e+00> : vector<4x8x32xf32>
    %59 = tpu.matmul %56, %58, %cst_26 {dimension_numbers = #tpu.dot_dimension_numbers<[2], [1], [1], [2], [0, 0, 0, 1, 1, 2], [0], [0]>} : vector<4x8x16xbf16>, vector<4x16x32xbf16>, vector<4x8x32xf32> -> vector<4x8x32xf32>
    "tpu.trace_stop"() : () -> ()
    %cst_27 = arith.constant dense<0.000000e+00> : vector<8x32xf32>
    %60 = vector.multi_reduction <add>, %59, %cst_27 [0] : vector<4x8x32xf32> to vector<8x32xf32>
    %c0_28 = arith.constant 0 : index
    %c0_29 = arith.constant 0 : index
    %c0_30 = arith.constant 0 : index
    %61 = vector.load %arg7[%c0_28, %c0_29, %c0_30] : memref<1x1x32xf32, #tpu.memory_space<vmem>>, vector<1x1x32xf32>
    %62 = vector.shape_cast %61 : vector<1x1x32xf32> to vector<1x32xf32>
    %63 = vector.broadcast %62 : vector<1x32xf32> to vector<8x32xf32>
    %64 = arith.addf %60, %63 : vector<8x32xf32>
    %65 = arith.addf %64, %3 : vector<8x32xf32>
    %c0_31 = arith.constant 0 : index
    %c0_32 = arith.constant 0 : index
    %c0_33 = arith.constant 0 : index
    %66 = vector.load %arg8[%c0_31, %c0_32, %c0_33] : memref<1x1x32xf32, #tpu.memory_space<vmem>>, vector<1x1x32xf32>
    %67 = vector.shape_cast %66 : vector<1x1x32xf32> to vector<1x32xf32>
    %c0_34 = arith.constant 0 : index
    %c0_35 = arith.constant 0 : index
    %c0_36 = arith.constant 0 : index
    %68 = vector.load %arg9[%c0_34, %c0_35, %c0_36] : memref<1x1x32xf32, #tpu.memory_space<vmem>>, vector<1x1x32xf32>
    %69 = vector.shape_cast %68 : vector<1x1x32xf32> to vector<1x32xf32>
    %cst_37 = arith.constant dense<0.000000e+00> : vector<8xf32>
    %70 = vector.multi_reduction <add>, %65, %cst_37 [1] : vector<8x32xf32> to vector<8xf32>
    %71 = vector.shape_cast %70 : vector<8xf32> to vector<8x1xf32>
    %cst_38 = arith.constant 3.200000e+01 : f32
    %72 = vector.broadcast %cst_38 : f32 to vector<8x1xf32>
    %73 = arith.divf %71, %72 : vector<8x1xf32>
    %74 = vector.broadcast %73 : vector<8x1xf32> to vector<8x32xf32>
    %75 = arith.subf %65, %74 : vector<8x32xf32>
    %76 = arith.mulf %75, %75 : vector<8x32xf32>
    %cst_39 = arith.constant dense<0.000000e+00> : vector<8xf32>
    %77 = vector.multi_reduction <add>, %76, %cst_39 [1] : vector<8x32xf32> to vector<8xf32>
    %78 = vector.shape_cast %77 : vector<8xf32> to vector<8x1xf32>
    %cst_40 = arith.constant 3.200000e+01 : f32
    %79 = vector.broadcast %cst_40 : f32 to vector<8x1xf32>
    %80 = arith.divf %78, %79 : vector<8x1xf32>
    %81 = vector.broadcast %73 : vector<8x1xf32> to vector<8x32xf32>
    %82 = arith.subf %65, %81 : vector<8x32xf32>
    %cst_41 = arith.constant 9.99999974E-6 : f32
    %83 = vector.broadcast %cst_41 : f32 to vector<8x1xf32>
    %84 = arith.addf %80, %83 : vector<8x1xf32>
    %85 = math.rsqrt %84 : vector<8x1xf32>
    %86 = vector.broadcast %85 : vector<8x1xf32> to vector<8x32xf32>
    %87 = arith.mulf %82, %86 : vector<8x32xf32>
    %88 = vector.broadcast %67 : vector<1x32xf32> to vector<8x32xf32>
    %89 = arith.mulf %87, %88 : vector<8x32xf32>
    %90 = vector.broadcast %69 : vector<1x32xf32> to vector<8x32xf32>
    %91 = arith.addf %89, %90 : vector<8x32xf32>
    %92 = arith.truncf %91 : vector<8x32xf32> to vector<8x32xbf16>
    %c0_42 = arith.constant 0 : index
    %c0_43 = arith.constant 0 : index
    %c0_44 = arith.constant 0 : index
    %93 = vector.load %arg10[%c0_42, %c0_43, %c0_44] : memref<1x32x64xbf16, #tpu.memory_space<vmem>>, vector<1x32x64xbf16>
    %94 = vector.shape_cast %93 : vector<1x32x64xbf16> to vector<32x64xbf16>
    %cst_45 = arith.constant dense<0.000000e+00> : vector<8x64xf32>
    %95 = tpu.matmul %92, %94, %cst_45 {dimension_numbers = #tpu.dot_dimension_numbers<[1], [0], [0], [1], [0, 0, 1, 1], [], []>} : vector<8x32xbf16>, vector<32x64xbf16>, vector<8x64xf32> -> vector<8x64xf32>
    %c0_46 = arith.constant 0 : index
    %c0_47 = arith.constant 0 : index
    %c0_48 = arith.constant 0 : index
    %96 = vector.load %arg11[%c0_46, %c0_47, %c0_48] : memref<1x1x64xf32, #tpu.memory_space<vmem>>, vector<1x1x64xf32>
    %97 = vector.shape_cast %96 : vector<1x1x64xf32> to vector<1x64xf32>
    %98 = vector.broadcast %97 : vector<1x64xf32> to vector<8x64xf32>
    %99 = arith.addf %95, %98 : vector<8x64xf32>
    %cst_49 = arith.constant 5.000000e-01 : f32
    %100 = vector.broadcast %cst_49 : f32 to vector<8x64xf32>
    %101 = arith.mulf %100, %99 : vector<8x64xf32>
    %cst_50 = arith.constant 0.707106769 : f32
    %102 = vector.broadcast %cst_50 : f32 to vector<8x64xf32>
    %103 = arith.mulf %99, %102 : vector<8x64xf32>
    %104 = math.erf %103 : vector<8x64xf32>
    %cst_51 = arith.constant 1.000000e+00 : f32
    %105 = vector.broadcast %cst_51 : f32 to vector<8x64xf32>
    %106 = arith.addf %105, %104 : vector<8x64xf32>
    %107 = arith.mulf %101, %106 : vector<8x64xf32>
    %108 = arith.truncf %107 : vector<8x64xf32> to vector<8x64xbf16>
    %c0_52 = arith.constant 0 : index
    %c0_53 = arith.constant 0 : index
    %c0_54 = arith.constant 0 : index
    %109 = vector.load %arg12[%c0_52, %c0_53, %c0_54] : memref<1x64x32xbf16, #tpu.memory_space<vmem>>, vector<1x64x32xbf16>
    %110 = vector.shape_cast %109 : vector<1x64x32xbf16> to vector<64x32xbf16>
    %cst_55 = arith.constant dense<0.000000e+00> : vector<8x32xf32>
    %111 = tpu.matmul %108, %110, %cst_55 {dimension_numbers = #tpu.dot_dimension_numbers<[1], [0], [0], [1], [0, 0, 1, 1], [], []>} : vector<8x64xbf16>, vector<64x32xbf16>, vector<8x32xf32> -> vector<8x32xf32>
    %c0_56 = arith.constant 0 : index
    %c0_57 = arith.constant 0 : index
    %c0_58 = arith.constant 0 : index
    %112 = vector.load %arg13[%c0_56, %c0_57, %c0_58] : memref<1x1x32xf32, #tpu.memory_space<vmem>>, vector<1x1x32xf32>
    %113 = vector.shape_cast %112 : vector<1x1x32xf32> to vector<1x32xf32>
    %114 = vector.broadcast %113 : vector<1x32xf32> to vector<8x32xf32>
    %115 = arith.addf %111, %114 : vector<8x32xf32>
    %116 = arith.addf %115, %65 : vector<8x32xf32>
    %c0_59 = arith.constant 0 : index
    %c0_60 = arith.constant 0 : index
    %117 = vector.load %arg15[%c0_59, %c0_60] : memref<8x32xf32, #tpu.memory_space<vmem>>, vector<8x32xf32>
    tpu.vector_store %arg15[%c0_59, %c0_60], %116 {strides = array<i32>} : memref<8x32xf32, #tpu.memory_space<vmem>>, vector<8x32xf32>,
    %c1_i32 = arith.constant 1 : i32
    %118 = arith.cmpi eq, %arg1, %c1_i32 : i32
    %119 = arith.extui %118 : i1 to i32
    %c0_i32_61 = arith.constant 0 : i32
    %120 = arith.cmpi ne, %119, %c0_i32_61 : i32
    scf.if %120 {
      %c0_62 = arith.constant 0 : index
      %c0_63 = arith.constant 0 : index
      %c0_64 = arith.constant 0 : index
      %121 = vector.load %arg14[%c0_62, %c0_63, %c0_64] : memref<1x8x32xf32, #tpu.memory_space<vmem>>, vector<1x8x32xf32>
      %122 = vector.shape_cast %121 : vector<1x8x32xf32> to vector<8x32xf32>
      %123 = vector.shape_cast %116 : vector<8x32xf32> to vector<1x8x32xf32>
      tpu.vector_store %arg14[%c0_62, %c0_63, %c0_64], %123 {strides = array<i32>} : memref<1x8x32xf32, #tpu.memory_space<vmem>>, vector<1x8x32xf32>,
    } else {
    }
    return
  }
  func.func @transform_0(%arg0: i32, %arg1: i32) -> (i32, i32, i32) {
    %c0_i32 = arith.constant 0 : i32
    %c0_i32_0 = arith.constant 0 : i32
    %c0_i32_1 = arith.constant 0 : i32
    return %arg0, %c0_i32, %c0_i32_0 : i32, i32, i32
  }
  func.func @transform_1(%arg0: i32, %arg1: i32) -> (i32, i32, i32) {
    %c0_i32 = arith.constant 0 : i32
    %c0_i32_0 = arith.constant 0 : i32
    %c0_i32_1 = arith.constant 0 : i32
    return %arg1, %c0_i32, %c0_i32_0 : i32, i32, i32
  }
  func.func @transform_2(%arg0: i32, %arg1: i32) -> (i32, i32, i32) {
    %c0_i32 = arith.constant 0 : i32
    %c0_i32_0 = arith.constant 0 : i32
    %c0_i32_1 = arith.constant 0 : i32
    return %arg1, %c0_i32, %c0_i32_0 : i32, i32, i32
  }
  func.func @transform_3(%arg0: i32, %arg1: i32) -> (i32, i32, i32, i32) {
    %c0_i32 = arith.constant 0 : i32
    %c0_i32_0 = arith.constant 0 : i32
    %c0_i32_1 = arith.constant 0 : i32
    %c0_i32_2 = arith.constant 0 : i32
    return %arg1, %c0_i32, %c0_i32_0, %c0_i32_1 : i32, i32, i32, i32
  }
  func.func @transform_4(%arg0: i32, %arg1: i32) -> (i32, i32, i32, i32) {
    %c0_i32 = arith.constant 0 : i32
    %c0_i32_0 = arith.constant 0 : i32
    %c0_i32_1 = arith.constant 0 : i32
    %c0_i32_2 = arith.constant 0 : i32
    return %arg1, %c0_i32, %c0_i32_0, %c0_i32_1 : i32, i32, i32, i32
  }
  func.func @transform_5(%arg0: i32, %arg1: i32) -> (i32, i32, i32) {
    %c0_i32 = arith.constant 0 : i32
    %c0_i32_0 = arith.constant 0 : i32
    %c0_i32_1 = arith.constant 0 : i32
    return %arg1, %c0_i32, %c0_i32_0 : i32, i32, i32
  }
  func.func @transform_6(%arg0: i32, %arg1: i32) -> (i32, i32, i32) {
    %c0_i32 = arith.constant 0 : i32
    %c0_i32_0 = arith.constant 0 : i32
    %c0_i32_1 = arith.constant 0 : i32
    return %arg1, %c0_i32, %c0_i32_0 : i32, i32, i32
  }
  func.func @transform_7(%arg0: i32, %arg1: i32) -> (i32, i32, i32) {
    %c0_i32 = arith.constant 0 : i32
    %c0_i32_0 = arith.constant 0 : i32
    %c0_i32_1 = arith.constant 0 : i32
    return %arg1, %c0_i32, %c0_i32_0 : i32, i32, i32
  }
  func.func @transform_8(%arg0: i32, %arg1: i32) -> (i32, i32, i32) {
    %c0_i32 = arith.constant 0 : i32
    %c0_i32_0 = arith.constant 0 : i32
    %c0_i32_1 = arith.constant 0 : i32
    return %arg1, %c0_i32, %c0_i32_0 : i32, i32, i32
  }
  func.func @transform_9(%arg0: i32, %arg1: i32) -> (i32, i32, i32) {
    %c0_i32 = arith.constant 0 : i32
    %c0_i32_0 = arith.constant 0 : i32
    %c0_i32_1 = arith.constant 0 : i32
    return %arg1, %c0_i32, %c0_i32_0 : i32, i32, i32
  }
  func.func @transform_10(%arg0: i32, %arg1: i32) -> (i32, i32, i32) {
    %c0_i32 = arith.constant 0 : i32
    %c0_i32_0 = arith.constant 0 : i32
    %c0_i32_1 = arith.constant 0 : i32
    return %arg1, %c0_i32, %c0_i32_0 : i32, i32, i32
  }
  func.func @transform_11(%arg0: i32, %arg1: i32) -> (i32, i32, i32) {
    %c0_i32 = arith.constant 0 : i32
    %c0_i32_0 = arith.constant 0 : i32
    %c0_i32_1 = arith.constant 0 : i32
    return %arg1, %c0_i32, %c0_i32_0 : i32, i32, i32
  }
  func.func @transform_12(%arg0: i32, %arg1: i32) -> (i32, i32, i32) {
    %c0_i32 = arith.constant 0 : i32
    %c0_i32_0 = arith.constant 0 : i32
    %c0_i32_1 = arith.constant 0 : i32
    return %arg0, %c0_i32, %c0_i32_0 : i32, i32, i32
  }
}

</mosaic_0001>

<bundles_post_ra>
// kernel: tpu_custom_call.1
= control target key start
LH: loop header
LB: loop body
LE: loop exit
PB: predicated region body
PF: predicated region fallthrough
CT: control target
= control target key end

     0   :  { %s3425_s0 = inlined_call_operand.vmem [shape: f32[2,8,32], index: 0, kind: input, shape index: {}]   ;;  %s3426_s1 = inlined_call_operand.vmem [shape: f32[2,1,32], index: 1, kind: input, shape index: {}]   ;;  %s3427_s2 = inlined_call_operand.vmem [shape: f32[2,1,32], index: 2, kind: input, shape index: {}]   ;;  %s3428_s3 = inlined_call_operand.vmem [shape: bf16[2,12,32,16], index: 3, kind: input, shape index: {}]   ;;  %s3429_s4 = inlined_call_operand.vmem [shape: bf16[2,4,16,32], index: 4, kind: input, shape index: {}]   ;;  %s3430_s5 = inlined_call_operand.vmem [shape: f32[2,1,32], index: 5, kind: input, shape index: {}]   ;;  %s3431_s6 = inlined_call_operand.vmem [shape: f32[2,1,32], index: 6, kind: input, shape index: {}]   ;;  %s3432_s7 = inlined_call_operand.vmem [shape: f32[2,1,32], index: 7, kind: input, shape index: {}]   ;;  %s3433_s8 = inlined_call_operand.vmem [shape: bf16[2,32,64], index: 8, kind: input, shape index: {}]   ;;  %s3434_s9 = inlined_call_operand.vmem [shape: f32[2,1,64], index: 9, kind: input, shape index: {}]   ;;  %s3435_s10 = inlined_call_operand.vmem [shape: bf16[2,64,32], index: 10, kind: input, shape index: {}]   ;;  %s3436_s11 = inlined_call_operand.vmem [shape: f32[2,1,32], index: 11, kind: input, shape index: {}]   ;;  %s3437_s12 = inlined_call_operand.hbm [shape: f32[2,8,32], index: 12, kind: output, shape index: {}]  }
   0x1   :  { %3453 = sst [smem:[#allocation19_spill]] %s3425_s0 }
   0x2   :  { %3454 = sst [smem:[#allocation20_spill]] %s3428_s3 }
   0x3   :  { %3455 = sst [smem:[#allocation21_spill]] %s3429_s4 }
   0x4   :  { %3456 = sst [smem:[#allocation22_spill]] %s3437_s12 }
   0x5   :  { %17 = vsyncpa [#allocation4], 0 }
   0x6   :  { %19 = vsyncpa [#allocation4 + $0x1], 0  ;;  %s2999_s21 = smov 0   ;;  %s3001_s22 = smov 0  }
   0x7   :  { %s3003_s23 = smov 0   ;;  %s3005_s24 = smov 0  }
   0x8   :  { %s3007_s25 = smov 0   ;;  %s3009_s26 = smov 0  }
   0x9   :  { %s3011_s27 = smov 0   ;;  %s3013_s28 = smov 0  }
   0xa LB: > { %3457 = sst [smem:[#allocation6_spill]] %s2901_s21  ;;  %s2361_s29 = sadd.s32 4294967295, %s2929_s28   ;;  %s2929_s28 = sphi %s3013_s28, %s25_s28   ;;  %s2925_s27 = sphi %s3011_s27, %s3495_s27   ;;  %s2921_s26 = sphi %s3009_s26, %s3494_s26   ;;  %s2917_s25 = sphi %s3007_s25, %s3493_s25   ;;  %s2913_s24 = sphi %s3005_s24, %s3492_s24   ;;  %s2909_s23 = sphi %s3003_s23, %s3491_s23   ;;  %s2905_s22 = sphi %s3001_s22, %s3490_s22   ;;  %s2901_s21 = sphi %s2999_s21, %s3489_s21  }
   0xb   : > { %3458 = sst [smem:[#allocation7_spill]] %s2905_s22  ;;  %s2362_s30 = sadd.s32 4294967294, %s2929_s28  }
   0xc   : > { %3459 = sst [smem:[#allocation8_spill]] %s2909_s23  ;;  %s34_s13 = sadd.s32 1, %s2921_s26 }
   0xd   : > { %3460 = sst [smem:[#allocation9_spill]] %s2913_s24  ;;  %p35_p0 = scmp.ge.s32.totalorder %s34_s13, 2 }
   0xe   : > { %3461 = sst [smem:[#allocation10_spill]] %s2917_s25  ;;  %s37_s14 = sadd.s32 1, %s2925_s27 }
   0xf   : > { %3462 = sst [smem:[#allocation11_spill]] %s2921_s26  ;;  %p366_p1 = scmp.ne.s32.totalorder %s2909_s23, %s2905_s22 }
  0x10   : > { %3463 = sst [smem:[#allocation12_spill]] %s2925_s27  ;;  %p367_p2 = scmp.eq.s32.totalorder %s2361_s29, 3 }
  0x11   : > { %3464 = sst [smem:[#allocation13_spill]] %s2929_s28  ;;  %s3497_s13 = smov (%p35_p0, %s34_s13), 0 }
  0x12   : > { %3465 = sst [smem:[#allocation14_spill]] %s3497_s13  ;;  %s3499_s14 = smov (!%p35_p0, %s37_s14), %s2925_s27 }
  0x13   : > { %p3048_p3 = por %p367_p2, %p366_p1  ;;  %p372_p4 = scmp.ne.s32.totalorder %s2905_s22, %s2901_s21 }
  0x14   : > { %p39_p5 = scmp.ge.s32.totalorder %s3499_s14, 2  ;;  %p373_p6 = scmp.eq.s32.totalorder %s2362_s30, 3 }
  0x15   : > { %s3466_s15 = scalar_select %p3048_p3, 1, 0 }
  0x16   : > { %p2365_p7 = scmp.ge.s32.totalorder %s2929_s28, 1  ;;  %p472_p8 = scmp.lt.s32.totalorder %s2929_s28, 5 }
  0x17   : > { %3467 = sst [smem:[#allocation15_spill]] %s3466_s15  ;;  %s3501_s14 = smov (%p39_p5, %s3499_s14), 0 }
  0x18   : > { %3468 = sst [smem:[#allocation16_spill]] %s3501_s14  ;;  %p3058_p9 = por %p373_p6, %p372_p4 }
  0x19   : > { %p473_p10 = pnand %p2365_p7, %p472_p8  ;;  %s353_s17 = ssub.s32 %s2925_s27, %s3501_s14 }
  0x1a   : > { %s3469_s16 = scalar_select %p3058_p9, 1, 0 }
  0x1b   : > { %s356_s18 = sadd.s32 1, %s2909_s23  ;;  %p354_p11 = scmp.eq.s32.totalorder %s353_s17, 0 }
  0x1c   : > { %3470 = sst [smem:[#allocation17_spill]] %s3469_s16  ;;  %476 = sbr.rel (%p473_p10) target bundleno = 2259 (0x8d3), region = 68 }
  0x1d   : > { %s3066_s19 = scalar_select %p354_p11, %s2909_s23, %s356_s18  }
  0x1e   : > { %s3439_s20 = sand.u32 (!%p473_p10), 1, %s2905_s22   ;;  %p554_p12 = scmp.lt.s32.totalorder (!%p473_p10), %s2917_s25, 1 }
  0x1f   : > { %3471 = sst [smem:[#allocation18_spill]] %s3066_s19  ;;  %s3072_s29 = sshll.u32 (!%p473_p10), %s3439_s20, 3 }
  0x20   : > { %p558_p13 = scmp.lt.s32.totalorder (!%p473_p10), %s2913_s24, 1  ;;  %s3472_s0 = sld [smem:[#allocation19_spill]] (!%p473_p10) }
  0x21   : > { %s555_s30 = scalar_select %p554_p12, %s2917_s25, 1 }
  0x22   : > { %s3077_s13 = scalar_select %p558_p13, %s2913_s24, 1 }
  0x23   : > { %s2367_s17 = sshll.u32 %s555_s30, 3  ;;  %s3473_s3 = sld [smem:[#allocation20_spill]] }
  0x24   : > { %s2707_s28 = smul.u32 192, %s3077_s13  ;;  %s2448_s12 = sshll.u32 %s3077_s13, 5 }
  0x25   : > { %s3474_s4 = sld [smem:[#allocation21_spill]]  ;;  %s579_s23 = scalar_lea.vmem %s3431_s6, %s3077_s13 }
  0x26   : > { %s557_s20 = scalar_lea.vmem %s3472_s0, %s2367_s17  ;;  %s2449_s22 = sshll.u32 %s3077_s13, 4 }
  0x27   : > { %s590_s24 = scalar_lea.vmem %s3434_s9, %s3077_s13  ;;  %s598_s21 = scalar_lea.vmem %s3436_s11, %s3077_s13 }
  0x28   : > { %s553_s16 = scalar_lea.vmem [#allocation3], %s3072_s29  ;;  %s3475_s0 = sld [smem:[#allocation9_spill]] }
  0x29   : > { %s3099_s14 = scalar_lea.vmem %s3473_s3, %s2707_s28  ;;  %s3122_s3 = scalar_lea.vmem %s3433_s8, %s2449_s22 }
  0x2b   : > { %s3104_s26 = scalar_lea.vmem %s3474_s4, %s2448_s12  ;;  %s3127_s4 = scalar_lea.vmem %s3435_s10, %s2448_s12 }
  0x2e   : > { %p2375_p0 = scmp.ne.s32.totalorder %s3475_s0, 0 }
  0x30   : > { %603 = sbr.rel (%p2375_p0) target bundleno = 55 (0x37), region = 72 }
  0x35   : > { %v604_v0 = vld [vmem:[%s557_s20] sm:$0xff]  ;;  %vm605_vm0 = vcmask 261120  }
  0x36   : > { %606 = vst.msk [vmem:[#allocation2] sm:$0xff] %vm605_vm0, %v604_v0 }
  0x37 PF: > { %vm610_vm1 = vcmask 261120   ;;  %v2781_v8 = vld [vmem:[%s3099_s14 + $0x8] sm:$0xff]   ;;  %v2782_v9 = vld [vmem:[%s3099_s14 + $0x18] sm:$0xff]   ;;  %v2931_v10 = vmov 0.0   ;;  %v2783_v11 = vld [vmem:[%s3099_s14] sm:$0xff]   ;;  %vm2932_vm2 = vmmov 0   ;;  %s3476_s25 = scalar_lea.vmem %s3426_s1, %s3077_s13  ;;  %s3477_s15 = scalar_lea.vmem %s3427_s2, %s3077_s13 }
  0x38   : > { %2519 = vmatprep.subr.bf16.mxu0 %v2931_v10  ;;  %2527 = vmatprep.subr.bf16.mxu1 %v2931_v10  ;;  %v2784_v12 = vld [vmem:[%s3099_s14 + $0x10] sm:$0xff]   ;;  %v2376_v17 = vld [vmem:[%s3476_s25] ss:$0 sm:$0xff]  ;;  %v2785_v22 = vld [vmem:[%s3099_s14 + $0x28] sm:$0xff]   ;;  %vm1327_vm3 = vcmask 130048   ;;  %vm1568_vm4 = vcmask 1043456   ;;  %s3478_s28 = scalar_lea.vmem %s3430_s5, %s3077_s13 }
  0x39   : > { %2520 = vmatpush3.bf16.msra.mxu0 %v2781_v8  ;;  %2528 = vmatpush3.bf16.msra.mxu1 %v2782_v9  ;;  %v2377_v19 = vld [vmem:[%s3477_s15] ss:$0 sm:$0xff]  ;;  %v2786_v23 = vld [vmem:[%s3099_s14 + $0x38] sm:$0xff]   ;;  %v2788_v26 = vld [vmem:[%s3099_s14 + $0x30] sm:$0xff]   ;;  %vm1516_vm5 = vcmask 64512   ;;  %vm2115_vm6 = vcmask 523264  }
  0x3a   : > { %2521 = vmatprep.subr.bf16.mxu0 %v2931_v10  ;;  %2529 = vmatprep.subr.bf16.mxu1 %v2931_v10  ;;  %v2787_v25 = vld [vmem:[%s3099_s14 + $0x20] sm:$0xff]   ;;  %v2789_v27 = vld [vmem:[%s3099_s14 + $0x48] sm:$0xff]   ;;  %v2790_v28 = vld [vmem:[%s3099_s14 + $0x58] sm:$0xff]  }
  0x3b   : > { %2523 = vmatprep.mubr.msk.bf16.mxu0 %vm2932_vm2, %v2931_v10  ;;  %2531 = vmatprep.mubr.msk.bf16.mxu1 %vm2932_vm2, %v2931_v10  ;;  %v2791_v29 = vld [vmem:[%s3099_s14 + $0x40] sm:$0xff]   ;;  %v2792_v30 = vld [vmem:[%s3099_s14 + $0x50] sm:$0xff]   ;;  %v2793_v31 = vld [vmem:[%s3099_s14 + $0x68] sm:$0xff]  }
  0x3c   : > { %v2794_v32 = vld [vmem:[%s3099_s14 + $0x78] sm:$0xff]   ;;  %v2795_v33 = vld [vmem:[%s3099_s14 + $0x60] sm:$0xff]   ;;  %v2796_v34 = vld [vmem:[%s3099_s14 + $0x70] sm:$0xff]  }
  0x3d   : > { %v3135_v1 = vld [vmem:[#allocation2] sm:$0xff]  ;;  %2522 = vmatpush3.bf16.msra.mxu0 %v2783_v11  ;;  %2530 = vmatpush3.bf16.msra.mxu1 %v2784_v12  ;;  %v2797_v35 = vld [vmem:[%s3099_s14 + $0x88] sm:$0xff]   ;;  %v2798_v36 = vld [vmem:[%s3099_s14 + $0x98] sm:$0xff]  }
  0x3e   : > { %v611_v2 = vsel %vm610_vm1, %v3135_v1, 0.0  ;;  %2535 = vmatprep.subr.bf16.mxu0 %v2931_v10  ;;  %2543 = vmatprep.subr.bf16.mxu1 %v2931_v10  ;;  %v2799_v37 = vld [vmem:[%s3099_s14 + $0x80] sm:$0xff]   ;;  %v2800_v38 = vld [vmem:[%s3099_s14 + $0x90] sm:$0xff]   ;;  %v2801_v39 = vld [vmem:[%s3099_s14 + $0xa8] sm:$0xff]  }
  0x3f   : > { %612 = vadd.xlane.f32.xlu0 %v611_v2  ;;  %v2802_v40 = vld [vmem:[%s3099_s14 + $0xb8] sm:$0xff]   ;;  %v2803_v41 = vld [vmem:[%s3099_s14 + $0xa0] sm:$0xff]   ;;  %v2804_v42 = vld [vmem:[%s3099_s14 + $0xb0] sm:$0xff]  }
  0xc8   : > { %v613_v3 = vpop.xlane.xlu0 %612 }
  0xc9   : > { %v615_v4 = vmul.f32 0.03125, %v613_v3 }
  0xcb   : > { %v616_v5 = vsub.f32 %v3135_v1, %v615_v4 }
  0xcd   : > { %v617_v6 = vmul.f32 %v616_v5, %v616_v5 }
  0xcf   : > { %v618_v7 = vsel %vm610_vm1, %v617_v6, 0.0 }
  0xd0   : > { %619 = vadd.xlane.f32.xlu0 %v618_v7 }
 0x159   : > { %v620_v13 = vpop.xlane.xlu0 %619 }
 0x15a   : > { %v621_v14 = vmul.f32 0.03125, %v620_v13 }
 0x15c   : > { %v622_v15 = vadd.f32 1e-05, %v621_v14 }
 0x15e   : > { %2815 = vrsqrt.f32 %v622_v15 }
 0x16b   : > { %v2816_v16 = vpop.eup %2815 }
 0x16c   : > { %v624_v18 = vmul.f32 %v2816_v16, %v616_v5 }
 0x16e   : > { %v631_v20 = vmul.f32 %v2376_v17, %v624_v18 }
 0x170   : > { %v638_v21 = vadd.f32 %v2377_v19, %v631_v20 }
 0x172   : > { %v3167_v24 = vpack.c.bf16 %v638_v21, %v638_v21 }
 0x174   : > { %2524 = vmatmul.mubr.msk.bf16.vlgmr.msra.gmra.mxu0 %vm610_vm1, %v3167_v24  ;;  %2532 = vmatmul.mubr.msk.bf16.vlgmr.msra.gmra.mxu1 %vm610_vm1, %v3167_v24 }
 0x175   : > { %2536 = vmatpush3.bf16.msra.mxu0 %v2785_v22  ;;  %2544 = vmatpush3.bf16.msra.mxu1 %v2786_v23 }
 0x176   : > { %2537 = vmatprep.subr.bf16.mxu0 %v2931_v10  ;;  %2545 = vmatprep.subr.bf16.mxu1 %v2931_v10 }
 0x177   : > { %2539 = vmatprep.mubr.msk.bf16.mxu0 %vm2932_vm2, %v2931_v10  ;;  %2547 = vmatprep.mubr.msk.bf16.mxu1 %vm2932_vm2, %v2931_v10 }
 0x179   : > { %2538 = vmatpush3.bf16.msra.mxu0 %v2787_v25  ;;  %2546 = vmatpush3.bf16.msra.mxu1 %v2788_v26 }
 0x17a   : > { %2551 = vmatprep.subr.bf16.mxu0 %v2931_v10  ;;  %2559 = vmatprep.subr.bf16.mxu1 %v2931_v10 }
 0x17c   : > { %2540 = vmatmul.mubr.msk.bf16.vlgmr.msra.gmra.mxu0 %vm610_vm1, %v3167_v24  ;;  %2548 = vmatmul.mubr.msk.bf16.vlgmr.msra.gmra.mxu1 %vm610_vm1, %v3167_v24 }
 0x17d   : > { %2552 = vmatpush3.bf16.msra.mxu0 %v2789_v27  ;;  %2560 = vmatpush3.bf16.msra.mxu1 %v2790_v28 }
 0x17e   : > { %2553 = vmatprep.subr.bf16.mxu0 %v2931_v10  ;;  %2561 = vmatprep.subr.bf16.mxu1 %v2931_v10 }
 0x17f   : > { %2555 = vmatprep.mubr.msk.bf16.mxu0 %vm2932_vm2, %v2931_v10  ;;  %2563 = vmatprep.mubr.msk.bf16.mxu1 %vm2932_vm2, %v2931_v10 }
 0x181   : > { %2554 = vmatpush3.bf16.msra.mxu0 %v2791_v29  ;;  %2562 = vmatpush3.bf16.msra.mxu1 %v2792_v30 }
 0x182   : > { %2567 = vmatprep.subr.bf16.mxu0 %v2931_v10  ;;  %2575 = vmatprep.subr.bf16.mxu1 %v2931_v10 }
 0x184   : > { %2556 = vmatmul.mubr.msk.bf16.vlgmr.msra.gmra.mxu0 %vm610_vm1, %v3167_v24  ;;  %2564 = vmatmul.mubr.msk.bf16.vlgmr.msra.gmra.mxu1 %vm610_vm1, %v3167_v24 }
 0x185   : > { %2568 = vmatpush3.bf16.msra.mxu0 %v2793_v31  ;;  %2576 = vmatpush3.bf16.msra.mxu1 %v2794_v32 }
 0x186   : > { %2569 = vmatprep.subr.bf16.mxu0 %v2931_v10  ;;  %2577 = vmatprep.subr.bf16.mxu1 %v2931_v10 }
 0x187   : > { %2571 = vmatprep.mubr.msk.bf16.mxu0 %vm2932_vm2, %v2931_v10  ;;  %2579 = vmatprep.mubr.msk.bf16.mxu1 %vm2932_vm2, %v2931_v10 }
 0x189   : > { %2570 = vmatpush3.bf16.msra.mxu0 %v2795_v33  ;;  %2578 = vmatpush3.bf16.msra.mxu1 %v2796_v34 }
 0x18a   : > { %2583 = vmatprep.subr.bf16.mxu0 %v2931_v10  ;;  %2591 = vmatprep.subr.bf16.mxu1 %v2931_v10 }
 0x18c   : > { %2572 = vmatmul.mubr.msk.bf16.vlgmr.msra.gmra.mxu0 %vm610_vm1, %v3167_v24  ;;  %2580 = vmatmul.mubr.msk.bf16.vlgmr.msra.gmra.mxu1 %vm610_vm1, %v3167_v24 }
 0x18d   : > { %2584 = vmatpush3.bf16.msra.mxu0 %v2797_v35  ;;  %2592 = vmatpush3.bf16.msra.mxu1 %v2798_v36 }
 0x18e   : > { %2585 = vmatprep.subr.bf16.mxu0 %v2931_v10  ;;  %2593 = vmatprep.subr.bf16.mxu1 %v2931_v10 }
 0x18f   : > { %2587 = vmatprep.mubr.msk.bf16.mxu0 %vm2932_vm2, %v2931_v10  ;;  %2595 = vmatprep.mubr.msk.bf16.mxu1 %vm2932_vm2, %v2931_v10 }
 0x191   : > { %2586 = vmatpush3.bf16.msra.mxu0 %v2799_v37  ;;  %2594 = vmatpush3.bf16.msra.mxu1 %v2800_v38 }
 0x192   : > { %2599 = vmatprep.subr.bf16.mxu0 %v2931_v10  ;;  %2607 = vmatprep.subr.bf16.mxu1 %v2931_v10 }
 0x194   : > { %2588 = vmatmul.mubr.msk.bf16.vlgmr.msra.gmra.mxu0 %vm610_vm1, %v3167_v24  ;;  %2596 = vmatmul.mubr.msk.bf16.vlgmr.msra.gmra.mxu1 %vm610_vm1, %v3167_v24 }
 0x195   : > { %2600 = vmatpush3.bf16.msra.mxu0 %v2801_v39  ;;  %2608 = vmatpush3.bf16.msra.mxu1 %v2802_v40 }
 0x196   : > { %2601 = vmatprep.subr.bf16.mxu0 %v2931_v10  ;;  %2609 = vmatprep.subr.bf16.mxu1 %v2931_v10 }
 0x197   : > { %2603 = vmatprep.mubr.msk.bf16.mxu0 %vm2932_vm2, %v2931_v10  ;;  %2611 = vmatprep.mubr.msk.bf16.mxu1 %vm2932_vm2, %v2931_v10 }
 0x199   : > { %2602 = vmatpush3.bf16.msra.mxu0 %v2803_v41  ;;  %2610 = vmatpush3.bf16.msra.mxu1 %v2804_v42 }
 0x19a   : > { %2615 = vmatprep.subr.bf16.mxu0 %v2931_v10  ;;  %2621 = vmatprep.subr.bf16.mxu1 %v2931_v10 }
 0x19c   : > { %2604 = vmatmul.mubr.msk.bf16.vlgmr.msra.gmra.mxu0 %vm610_vm1, %v3167_v24  ;;  %2612 = vmatmul.mubr.msk.bf16.vlgmr.msra.gmra.mxu1 %vm610_vm1, %v3167_v24 }
 0x19d   : > { %2617 = vmatprep.mubr.msk.bf16.mxu0 %vm2932_vm2, %v2931_v10  ;;  %2623 = vmatprep.mubr.msk.bf16.mxu1 %vm2932_vm2, %v2931_v10 }
 0x234   : > { %v737_v43 = vpop.f32.mrf.mxu0  ;;  %v789_v44 = vpop.f32.mrf.mxu1 }
 0x235   : > { %v1315_v11 = vpack.c.bf16 %v737_v43, %v737_v43  ;;  %v1316_v12 = vpack.c.bf16 %v789_v44, %v789_v44 }
 0x236   : > { %v2525_v45 = vpop.f32.mrf.mxu0  ;;  %v2533_v46 = vpop.f32.mrf.mxu1 }
 0x238   : > { %v740_v47 = vpop.f32.mrf.mxu0  ;;  %v792_v48 = vpop.f32.mrf.mxu1 }
 0x23a   : > { %v2526_v49 = vpop.f32.mrf.mxu0  ;;  %v2534_v50 = vpop.f32.mrf.mxu1 }
 0x23c   : > { %v841_v51 = vpop.f32.mrf.mxu0  ;;  %v893_v52 = vpop.f32.mrf.mxu1 }
 0x23d   : > { %v1317_v25 = vpack.c.bf16 %v841_v51, %v841_v51  ;;  %v1318_v26 = vpack.c.bf16 %v893_v52, %v893_v52 }
 0x23e   : > { %v2541_v53 = vpop.f32.mrf.mxu0  ;;  %v2549_v54 = vpop.f32.mrf.mxu1 }
 0x240   : > { %v844_v55 = vpop.f32.mrf.mxu0  ;;  %v896_v56 = vpop.f32.mrf.mxu1 }
 0x242   : > { %v2542_v57 = vpop.f32.mrf.mxu0  ;;  %v2550_v58 = vpop.f32.mrf.mxu1 }
 0x244   : > { %v945_v59 = vpop.f32.mrf.mxu0  ;;  %v997_v60 = vpop.f32.mrf.mxu1 }
 0x245   : > { %v1319_v61 = vpack.c.bf16 %v945_v59, %v945_v59  ;;  %v1320_v62 = vpack.c.bf16 %v997_v60, %v997_v60 }
 0x246   : > { %v2557_v63 = vpop.f32.mrf.mxu0  ;;  %v2565_v0 = vpop.f32.mrf.mxu1 }
 0x247   : > { %v1332_v2 = vsel %vm1327_vm3, %v1319_v61, 0  ;;  %v1378_v3 = vsel %vm1327_vm3, %v1320_v62, 0 }
 0x248   : > { %v948_v4 = vpop.f32.mrf.mxu0  ;;  %v1000_v5 = vpop.f32.mrf.mxu1  ;;  %2616 = vmatpush3.bf16.xpose.msra.mxu0 %v1332_v2  ;;  %2622 = vmatpush3.bf16.xpose.msra.mxu1 %v1378_v3 }
 0x249   : > { %2627 = vmatprep.subr.bf16.mxu0 %v2931_v10  ;;  %2633 = vmatprep.subr.bf16.mxu1 %v2931_v10 }
 0x24a   : > { %v2558_v6 = vpop.f32.mrf.mxu0  ;;  %v2566_v7 = vpop.f32.mrf.mxu1 }
 0x24c   : > { %v1049_v8 = vpop.f32.mrf.mxu0  ;;  %v1101_v9 = vpop.f32.mrf.mxu1 }
 0x24d   : > { %v1321_v13 = vpack.c.bf16 %v1049_v8, %v1049_v8  ;;  %v1322_v14 = vpack.c.bf16 %v1101_v9, %v1101_v9 }
 0x24e   : > { %v2573_v15 = vpop.f32.mrf.mxu0  ;;  %v2581_v16 = vpop.f32.mrf.mxu1 }
 0x24f   : > { %v1424_v17 = vsel %vm1327_vm3, %v1321_v13, 0  ;;  %v1470_v18 = vsel %vm1327_vm3, %v1322_v14, 0  ;;  %2618 = vmatmul.mubr.msk.bf16.vlgmr.msra.gmra.mxu0 %vm1327_vm3, %v1315_v11  ;;  %2624 = vmatmul.mubr.msk.bf16.vlgmr.msra.gmra.mxu1 %vm1327_vm3, %v1316_v12 }
 0x250   : > { %v1052_v19 = vpop.f32.mrf.mxu0  ;;  %v1104_v20 = vpop.f32.mrf.mxu1  ;;  %2628 = vmatpush3.bf16.xpose.msra.mxu0 %v1424_v17  ;;  %2634 = vmatpush3.bf16.xpose.msra.mxu1 %v1470_v18 }
 0x251   : > { %2629 = vmatprep.mubr.msk.bf16.mxu0 %vm2932_vm2, %v2931_v10  ;;  %2635 = vmatprep.mubr.msk.bf16.mxu1 %vm2932_vm2, %v2931_v10 }
 0x252   : > { %v2574_v21 = vpop.f32.mrf.mxu0  ;;  %v2582_v22 = vpop.f32.mrf.mxu1  ;;  %2639 = vmatprep.subr.bf16.mxu0 %v2931_v10  ;;  %2645 = vmatprep.subr.bf16.mxu1 %v2931_v10 }
 0x254   : > { %v1153_v23 = vpop.f32.mrf.mxu0  ;;  %v1205_v24 = vpop.f32.mrf.mxu1 }
 0x255   : > { %v1323_v27 = vpack.c.bf16 %v1153_v23, %v1153_v23  ;;  %v1324_v28 = vpack.c.bf16 %v1205_v24, %v1205_v24 }
 0x256   : > { %v2589_v29 = vpop.f32.mrf.mxu0  ;;  %v2597_v30 = vpop.f32.mrf.mxu1 }
 0x257   : > { %v1570_v31 = vsel %vm1568_vm4, %v1323_v27, 0  ;;  %v1616_v32 = vsel %vm1568_vm4, %v1324_v28, 0  ;;  %2630 = vmatmul.mubr.msk.bf16.vlgmr.msra.gmra.mxu0 %vm1327_vm3, %v1317_v25  ;;  %2636 = vmatmul.mubr.msk.bf16.vlgmr.msra.gmra.mxu1 %vm1327_vm3, %v1318_v26 }
 0x258   : > { %v1156_v33 = vpop.f32.mrf.mxu0  ;;  %v1208_v34 = vpop.f32.mrf.mxu1  ;;  %2640 = vmatpush3.bf16.msra.mxu0 %v1570_v31  ;;  %2646 = vmatpush3.bf16.msra.mxu1 %v1616_v32 }
 0x259   : > { %2641 = vmatprep.mubr.msk.bf16.mxu0 %vm2932_vm2, %v2931_v10  ;;  %2651 = vmatprep.subr.bf16.mxu0 %v2931_v10 }
 0x25a   : > { %v2590_v35 = vpop.f32.mrf.mxu0  ;;  %v2598_v36 = vpop.f32.mrf.mxu1  ;;  %2647 = vmatprep.mubr.msk.bf16.mxu1 %vm2932_vm2, %v2931_v10  ;;  %2657 = vmatprep.subr.bf16.mxu1 %v2931_v10 }
 0x25c   : > { %v1257_v37 = vpop.f32.mrf.mxu0  ;;  %v1309_v38 = vpop.f32.mrf.mxu1 }
 0x25d   : > { %v1325_v39 = vpack.c.bf16 %v1257_v37, %v1257_v37  ;;  %v1326_v40 = vpack.c.bf16 %v1309_v38, %v1309_v38 }
 0x25e   : > { %v2605_v41 = vpop.f32.mrf.mxu0  ;;  %v2613_v42 = vpop.f32.mrf.mxu1 }
 0x25f   : > { %v3280_v43 = vsel %vm1568_vm4, %v1325_v39, 0  ;;  %v3283_v44 = vsel %vm1568_vm4, %v1326_v40, 0 }
 0x260   : > { %v1260_v45 = vpop.f32.mrf.mxu0  ;;  %v1312_v46 = vpop.f32.mrf.mxu1 }
 0x262   : > { %v2606_v47 = vpop.f32.mrf.mxu0  ;;  %v2614_v48 = vpop.f32.mrf.mxu1 }
 0x30f   : > { %v1368_v49 = vpop.f32.mrf.mxu0  ;;  %v1414_v50 = vpop.f32.mrf.mxu1 }
 0x310   : > { %v1512_v51 = vmul.f32 0.25, %v1368_v49  ;;  %v1513_v54 = vmul.f32 0.25, %v1414_v50  ;;  %v2807_v50 = vld [vmem:[%s3104_s26 + $0x10] sm:$0xff]  }
 0x311   : > { %v2619_v52 = vpop.f32.mrf.mxu0  ;;  %v2625_v53 = vpop.f32.mrf.mxu1 }
 0x312   : > { %v1517_v55 = vsel %vm1516_vm5, %v1512_v51, -inf  ;;  %v1520_v60 = vsel %vm1516_vm5, %v1513_v54, -inf }
 0x313   : > { %v1417_v56 = vpop.f32.mrf.mxu1  ;;  %1518 = vmax.xlane.f32.xlu1 %v1517_v55  ;;  %v1371_v57 = vpop.f32.mrf.mxu0  ;;  %v2808_v55 = vld [vmem:[%s3104_s26 + $0x18] sm:$0xff]  }
 0x315   : > { %v2620_v58 = vpop.f32.mrf.mxu0  ;;  %v2626_v59 = vpop.f32.mrf.mxu1 }
 0x317   : > { %v1506_v61 = vpop.f32.mrf.mxu1  ;;  %1521 = vmax.xlane.f32.xlu1 %v1520_v60  ;;  %v1460_v62 = vpop.f32.mrf.mxu0 }
 0x318   : > { %v1515_v63 = vmul.f32 0.25, %v1506_v61  ;;  %v1514_v0 = vmul.f32 0.25, %v1460_v62 }
 0x319   : > { %v2631_v2 = vpop.f32.mrf.mxu0  ;;  %v2637_v3 = vpop.f32.mrf.mxu1 }
 0x31a   : > { %v1526_v4 = vsel %vm1516_vm5, %v1515_v63, -inf  ;;  %v1523_v5 = vsel %vm1516_vm5, %v1514_v0, -inf }
 0x31b   : > { %v1509_v6 = vpop.f32.mrf.mxu1  ;;  %1527 = vmax.xlane.f32.xlu1 %v1526_v4  ;;  %1524 = vmax.xlane.f32.xlu0 %v1523_v5  ;;  %v1463_v7 = vpop.f32.mrf.mxu0 }
 0x31d   : > { %v2632_v8 = vpop.f32.mrf.mxu0  ;;  %v2638_v9 = vpop.f32.mrf.mxu1 }
 0x39c   : > { %v1519_v11 = vpop.xlane.xlu1 %1518 }
 0x39d   : > { %v1529_v12 = vsub.f32 %v1512_v51, %v1519_v11 }
 0x39f   : > { %v1533_v13 = vmul.f32 1.442695, %v1529_v12 }
 0x3a0   : > { %v1522_v14 = vpop.xlane.xlu1 %1521 }
 0x3a1   : > { %2817 = vpow2.f32 %v1533_v13  ;;  %v1530_v15 = vsub.f32 %v1513_v54, %v1522_v14 }
 0x3a3   : > { %v1535_v16 = vmul.f32 1.442695, %v1530_v15 }
 0x3a4   : > { %v1528_v17 = vpop.xlane.xlu1 %1527  ;;  %v1525_v18 = vpop.xlane.xlu0 %1524 }
 0x3a5   : > { %2819 = vpow2.f32 %v1535_v16  ;;  %v1532_v19 = vsub.f32 %v1515_v63, %v1528_v17  ;;  %v1531_v20 = vsub.f32 %v1514_v0, %v1525_v18 }
 0x3a7   : > { %v1539_v21 = vmul.f32 1.442695, %v1532_v19  ;;  %v1537_v22 = vmul.f32 1.442695, %v1531_v20 }
 0x3a9   : > { %2821 = vpow2.f32 %v1539_v21 }
 0x3aa   : > { %2823 = vpow2.f32 %v1537_v22 }
 0x3ae   : > { %v2818_v23 = vpop.eup %2817 }
 0x3af   : > { %v1541_v24 = vsel %vm1516_vm5, %v2818_v23, 0.0 }
 0x3b0   : > { %1542 = vadd.xlane.f32.xlu0 %v1541_v24 }
 0x3b2   : > { %v2820_v25 = vpop.eup %2819 }
 0x3b3   : > { %v1544_v26 = vsel %vm1516_vm5, %v2820_v25, 0.0 }
 0x3b4   : > { %1545 = vadd.xlane.f32.xlu1 %v1544_v26 }
 0x3b6   : > { %v2822_v27 = vpop.eup %2821 }
 0x3b7   : > { %v2824_v28 = vpop.eup %2823  ;;  %v1550_v29 = vsel %vm1516_vm5, %v2822_v27, 0.0 }
 0x3b8   : > { %1551 = vadd.xlane.f32.xlu1 %v1550_v29  ;;  %v1547_v30 = vsel %vm1516_vm5, %v2824_v28, 0.0 }
 0x3b9   : > { %1548 = vadd.xlane.f32.xlu0 %v1547_v30 }
 0x439   : > { %v1543_v31 = vpop.xlane.xlu0 %1542 }
 0x43a   : > { %2825 = vrcp.f32 %v1543_v31 }
 0x43d   : > { %v1546_v32 = vpop.xlane.xlu1 %1545 }
 0x43e   : > { %2827 = vrcp.f32 %v1546_v32 }
 0x441   : > { %v1552_v33 = vpop.xlane.xlu1 %1551 }
 0x442   : > { %2829 = vrcp.f32 %v1552_v33  ;;  %v1549_v34 = vpop.xlane.xlu0 %1548 }
 0x443   : > { %2831 = vrcp.f32 %v1549_v34 }
 0x447   : > { %v2826_v35 = vpop.eup %2825 }
 0x448   : > { %v1557_v36 = vmul.f32 %v2826_v35, %v2818_v23 }
 0x44a   : > { %v1561_v37 = vpack.c.bf16 %v1557_v36, %v1557_v36 }
 0x44b   : > { %v2828_v38 = vpop.eup %2827 }
 0x44c   : > { %2642 = vmatmul.mubr.msk.bf16.vlgmr.msra.gmra.mxu0 %vm1516_vm5, %v1561_v37  ;;  %v1558_v39 = vmul.f32 %v2828_v38, %v2820_v25 }
 0x44d   : > { %2652 = vmatpush3.bf16.msra.mxu0 %v3280_v43  ;;  %2653 = vmatprep.mubr.msk.bf16.mxu0 %vm2932_vm2, %v2931_v10  ;;  %v2805_v43 = vld [vmem:[%s3104_s26] sm:$0xff]  }
 0x44e   : > { %v1562_v40 = vpack.c.bf16 %v1558_v39, %v1558_v39  ;;  %2663 = vmatprep.subr.bf16.mxu0 %v2931_v10 }
 0x44f   : > { %v2830_v41 = vpop.eup %2829 }
 0x450   : > { %v2832_v42 = vpop.eup %2831  ;;  %2648 = vmatmul.mubr.msk.bf16.vlgmr.msra.gmra.mxu1 %vm1516_vm5, %v1562_v40  ;;  %v1560_v46 = vmul.f32 %v2830_v41, %v2822_v27  ;;  %v2430_v27 = vld [vmem:[%s3478_s28] ss:$0 sm:$0xff]  ;;  %v2809_v41 = vld [vmem:[%s3122_s3 + $0x8] sm:$0xff]  }
 0x451   : > { %2658 = vmatpush3.bf16.msra.mxu1 %v3283_v44  ;;  %v1559_v45 = vmul.f32 %v2832_v42, %v2824_v28  ;;  %2659 = vmatprep.mubr.msk.bf16.mxu1 %vm2932_vm2, %v2931_v10  ;;  %v2806_v44 = vld [vmem:[%s3104_s26 + $0x8] sm:$0xff]   ;;  %v2810_v42 = vld [vmem:[%s3122_s3] sm:$0xff]   ;;  %s3479_s3 = scalar_lea.vmem %s3432_s7, %s3077_s13 }
 0x452   : > { %2669 = vmatprep.subr.bf16.mxu1 %v2931_v10  ;;  %v1564_v48 = vpack.c.bf16 %v1560_v46, %v1560_v46 }
 0x453   : > { %v1563_v47 = vpack.c.bf16 %v1559_v45, %v1559_v45 }
 0x455   : > { %2654 = vmatmul.mubr.msk.bf16.vlgmr.msra.gmra.mxu0 %vm1516_vm5, %v1563_v47  ;;  %v2431_v47 = vld [vmem:[%s579_s23] ss:$0 sm:$0xff] }
 0x456   : > { %2664 = vmatpush3.bf16.msra.mxu0 %v2805_v43  ;;  %2665 = vmatprep.mubr.msk.bf16.mxu0 %vm2932_vm2, %v2931_v10 }
 0x457   : > { %2675 = vmatprep.subr.bf16.mxu0 %v2931_v10 }
 0x458   : > { %2660 = vmatmul.mubr.msk.bf16.vlgmr.msra.gmra.mxu1 %vm1516_vm5, %v1564_v48 }
 0x459   : > { %2671 = vmatprep.mubr.msk.bf16.mxu1 %vm2932_vm2, %v2931_v10  ;;  %2670 = vmatpush3.bf16.msra.mxu1 %v2806_v44  ;;  %v2432_v44 = vld [vmem:[%s3479_s3] ss:$0 sm:$0xff] }
 0x45a   : > { %2681 = vmatprep.subr.bf16.mxu1 %v2931_v10 }
 0x50c   : > { %v1606_v49 = vpop.f32.mrf.mxu0 }
 0x50d   : > { %v1750_v51 = vpack.c.bf16 %v1606_v49, %v1606_v49 }
 0x50e   : > { %v2643_v52 = vpop.f32.mrf.mxu0 }
 0x50f   : > { %2666 = vmatmul.mubr.msk.bf16.vlgmr.msra.gmra.mxu0 %vm1327_vm3, %v1750_v51  ;;  %v2811_v52 = vld [vmem:[%s3127_s4 + $0x18] sm:$0xff]  }
 0x510   : > { %v1609_v53 = vpop.f32.mrf.mxu0  ;;  %v1652_v54 = vpop.f32.mrf.mxu1  ;;  %2676 = vmatpush3.bf16.msra.mxu0 %v2807_v50  ;;  %2677 = vmatprep.mubr.msk.bf16.mxu0 %vm2932_vm2, %v2931_v10 }
 0x511   : > { %v1751_v56 = vpack.c.bf16 %v1652_v54, %v1652_v54  ;;  %2687 = vmatprep.subr.bf16.mxu0 %v2931_v10  ;;  %v2812_v53 = vld [vmem:[%s3127_s4 + $0x10] sm:$0xff]   ;;  %v2813_v54 = vld [vmem:[%s3127_s4 + $0x8] sm:$0xff]  }
 0x512   : > { %v2644_v57 = vpop.f32.mrf.mxu0  ;;  %v2649_v58 = vpop.f32.mrf.mxu1 }
 0x513   : > { %2672 = vmatmul.mubr.msk.bf16.vlgmr.msra.gmra.mxu1 %vm1327_vm3, %v1751_v56  ;;  %v2433_v56 = vld [vmem:[%s590_s24] ss:$0 sm:$0xff]  ;;  %s3480_s24 = sld [smem:[#allocation9_spill]] }
 0x514   : > { %v1655_v59 = vpop.f32.mrf.mxu1  ;;  %2682 = vmatpush3.bf16.msra.mxu1 %v2808_v55  ;;  %2683 = vmatprep.mubr.msk.bf16.mxu1 %vm2932_vm2, %v2931_v10  ;;  %v2814_v55 = vld [vmem:[%s3127_s4] sm:$0xff]  }
 0x515   : > { %v1698_v60 = vpop.f32.mrf.mxu0  ;;  %2695 = vmatprep.subr.bf16.mxu1 %v2931_v10 }
 0x516   : > { %v1752_v61 = vpack.c.bf16 %v1698_v60, %v1698_v60  ;;  %v2650_v62 = vpop.f32.mrf.mxu1 }
 0x517   : > { %v2655_v63 = vpop.f32.mrf.mxu0 }
 0x518   : > { %2678 = vmatmul.mubr.msk.bf16.vlgmr.msra.gmra.mxu0 %vm1327_vm3, %v1752_v61  ;;  %v1744_v0 = vpop.f32.mrf.mxu1 }
 0x519   : > { %v1701_v2 = vpop.f32.mrf.mxu0  ;;  %v1753_v3 = vpack.c.bf16 %v1744_v0, %v1744_v0  ;;  %2691 = vmatprep.mubr.msk.bf16.mxu0 %vm2932_vm2, %v2931_v10  ;;  %2688 = vmatpush3.bf16.msra.mxu0 %v2809_v41  ;;  %p2443_p1 = scmp.ne.s32.totalorder %s3480_s24, 1 }
 0x51a   : > { %v2661_v4 = vpop.f32.mrf.mxu1  ;;  %2689 = vmatprep.subr.bf16.mxu0 %v2931_v10 }
 0x51b   : > { %v2656_v5 = vpop.f32.mrf.mxu0  ;;  %2684 = vmatmul.mubr.msk.bf16.vlgmr.msra.gmra.mxu1 %vm1327_vm3, %v1753_v3  ;;  %v2437_v4 = vld [vmem:[%s598_s21] ss:$0 sm:$0xff] }
 0x51c   : > { %v1747_v6 = vpop.f32.mrf.mxu1  ;;  %2703 = vmatprep.mubr.msk.bf16.mxu1 %vm2932_vm2, %v2931_v10  ;;  %2696 = vmatpush3.bf16.msra.mxu1 %v2811_v52 }
 0x51d   : > { %2690 = vmatpush3.bf16.msra.mxu0 %v2810_v42  ;;  %2697 = vmatprep.subr.bf16.mxu1 %v2931_v10 }
 0x51e   : > { %v2662_v7 = vpop.f32.mrf.mxu1 }
 0x520   : > { %2698 = vmatpush3.bf16.msra.mxu1 %v2812_v53 }
 0x521   : > { %2699 = vmatprep.subr.bf16.mxu1 %v2931_v10 }
 0x524   : > { %2700 = vmatpush3.bf16.msra.mxu1 %v2813_v54 }
 0x525   : > { %2701 = vmatprep.subr.bf16.mxu1 %v2931_v10 }
 0x528   : > { %2702 = vmatpush3.bf16.msra.mxu1 %v2814_v55 }
 0x5cf   : > { %v1805_v8 = vpop.f32.mrf.mxu0 }
 0x5d0   : > { %v1958_v17 = vsel %vm610_vm1, %v1805_v8, 0.0 }
 0x5d1   : > { %v2667_v9 = vpop.f32.mrf.mxu0 }
 0x5d3   : > { %v1808_v11 = vpop.f32.mrf.mxu0  ;;  %v1854_v12 = vpop.f32.mrf.mxu1 }
 0x5d4   : > { %v1959_v15 = vsel %vm610_vm1, %v1854_v12, 0.0 }
 0x5d5   : > { %v2668_v13 = vpop.f32.mrf.mxu0  ;;  %v2673_v14 = vpop.f32.mrf.mxu1  ;;  %v1960_v19 = vadd.f32 %v1959_v15, %v1958_v17 }
 0x5d7   : > { %v1857_v16 = vpop.f32.mrf.mxu1 }
 0x5d8   : > { %v1903_v18 = vpop.f32.mrf.mxu0 }
 0x5d9   : > { %v1961_v20 = vsel %vm610_vm1, %v1903_v18, 0.0  ;;  %v2674_v21 = vpop.f32.mrf.mxu1 }
 0x5da   : > { %v2679_v22 = vpop.f32.mrf.mxu0  ;;  %v1962_v23 = vadd.f32 %v1961_v20, %v1960_v19 }
 0x5db   : > { %v1952_v24 = vpop.f32.mrf.mxu1 }
 0x5dc   : > { %v1906_v25 = vpop.f32.mrf.mxu0  ;;  %v1963_v26 = vsel %vm610_vm1, %v1952_v24, 0.0 }
 0x5dd   : > { %v1964_v28 = vadd.f32 %v1963_v26, %v1962_v23  ;;  %v2685_v29 = vpop.f32.mrf.mxu1 }
 0x5de   : > { %v2680_v30 = vpop.f32.mrf.mxu0 }
 0x5df   : > { %v1972_v31 = vadd.f32 %v2430_v27, %v1964_v28  ;;  %v1955_v32 = vpop.f32.mrf.mxu1 }
 0x5e1   : > { %v2686_v33 = vpop.f32.mrf.mxu1  ;;  %v1973_v34 = vadd.f32 %v1972_v31, %v3135_v1 }
 0x5e3   : > { %v1976_v35 = vsel %vm610_vm1, %v1973_v34, 0.0 }
 0x5e4   : > { %1977 = vadd.xlane.f32.xlu0 %v1976_v35 }
 0x66d   : > { %v1978_v36 = vpop.xlane.xlu0 %1977 }
 0x66e   : > { %v1979_v37 = vmul.f32 0.03125, %v1978_v36 }
 0x670   : > { %v1980_v38 = vsub.f32 %v1973_v34, %v1979_v37 }
 0x672   : > { %v1981_v39 = vmul.f32 %v1980_v38, %v1980_v38 }
 0x674   : > { %v1982_v40 = vsel %vm610_vm1, %v1981_v39, 0.0 }
 0x675   : > { %1983 = vadd.xlane.f32.xlu1 %v1982_v40 }
 0x6fe   : > { %v1984_v1 = vpop.xlane.xlu1 %1983 }
 0x6ff   : > { %v1985_v45 = vmul.f32 0.03125, %v1984_v1 }
 0x701   : > { %v1986_v46 = vadd.f32 1e-05, %v1985_v45 }
 0x703   : > { %2833 = vrsqrt.f32 %v1986_v46 }
 0x710   : > { %v2834_v43 = vpop.eup %2833 }
 0x711   : > { %v1988_v48 = vmul.f32 %v2834_v43, %v1980_v38 }
 0x713   : > { %v1995_v49 = vmul.f32 %v2431_v47, %v1988_v48 }
 0x715   : > { %v2002_v50 = vadd.f32 %v2432_v44, %v1995_v49 }
 0x717   : > { %v2003_v51 = vpack.c.bf16 %v2002_v50, %v2002_v50 }
 0x719   : > { %2692 = vmatmul.mubr.msk.bf16.vlgmr.msra.gmra.mxu0 %vm610_vm1, %v2003_v51 }
 0x7d9   : > { %v2064_v57 = vpop.f32.mrf.mxu0 }
 0x7da   : > { %v2065_v58 = vadd.f32 %v2433_v56, %v2064_v57 }
 0x7db   : > { %v2693_v59 = vpop.f32.mrf.mxu0 }
 0x7dc   : > { %v2071_v60 = vmul.f32 0.70710677, %v2065_v58  ;;  %v2070_v0 = vmul.f32 0.5, %v2065_v58 }
 0x7dd   : > { %v2067_v61 = vpop.f32.mrf.mxu0 }
 0x7de   : > { %2835 = verf.f32 %v2071_v60 }
 0x7df   : > { %v2694_v62 = vpop.f32.mrf.mxu0 }
 0x7eb   : > { %v2836_v63 = vpop.eup %2835 }
 0x7ec   : > { %v2073_v2 = vadd.f32 1.0, %v2836_v63 }
 0x7ee   : > { %v2074_v3 = vmul.f32 %v2073_v2, %v2070_v0 }
 0x7f0   : > { %v2075_v10 = vpack.c.bf16 %v2074_v3, %v2074_v3 }
 0x7f2   : > { %2704 = vmatmul.mubr.msk.bf16.vlgmr.msra.gmra.mxu1 %vm2115_vm6, %v2075_v10 }
 0x8b2   : > { %v2153_v5 = vpop.f32.mrf.mxu1 }
 0x8b3   : > { %v2154_v6 = vadd.f32 %v2437_v4, %v2153_v5 }
 0x8b4   : > { %v2705_v7 = vpop.f32.mrf.mxu1  ;;  %2164 = sbr.rel (%p2443_p1) target bundleno = 2234 (0x8ba), region = 76 }
 0x8b5   : > { %v2159_v8 = vadd.f32 %v2154_v6, %v1973_v34 }
 0x8b6   : > { %v2156_v9 = vpop.f32.mrf.mxu1 }
 0x8b7   : > { %2160 = vst.msk [vmem:[#allocation2] sm:$0xff] %vm610_vm1, %v2159_v8 }
 0x8b8   : > { %v2706_v11 = vpop.f32.mrf.mxu1 }
 0x8b9   : > { %2165 = vst.msk [vmem:[%s553_s16] sm:$0xff] %vm610_vm1, %v2159_v8 }
 0x8ba PF: > { %s3481_s12 = sld [smem:[#allocation10_spill]]  ;;  %s2180_s26 = sshll.u32 %s553_s16, 4  ;;  %s2181_s26 = int_to_ptr.vmem [resolvable:$true] %s2180_s26 }
 0x8bb   : > { %s3482_s13 = sld [smem:[#allocation7_spill]]  ;;  %s2837_s17 = scalar_lea.vmem %s2181_s26, 128 }
 0x8bc   : > { %s3484_s15 = sld [smem:[#allocation22_spill]]  ;;  %p2838_p2 = scmp.ne.s32.totalorder %s2181_s26, %s2837_s17 }
 0x8bd   : > { %s2933_s18 = smov [#allocation3]  }
 0x8be   : > { %p2839_p4 = pnand %p2838_p2, %p3048_p3  ;;  %s2841_s19 = sshll.u32 %s2933_s18, 4  ;;  %s2842_s19 = int_to_ptr.vmem [resolvable:$false] %s2841_s19 }
 0x8bf   : > { %s2843_s3 = scalar_lea.vmem %s2842_s19, 256  ;;  %p2844_p6 = scmp.lt.s32.totalorder %s2181_s26, %s2842_s19 }
 0x8c0   : > { %s2445_s25 = sshll.u32 %s3481_s12, 7  ;;  %p2840_p5 = pneg %p2839_p4 }
 0x8c1   : > { %s3485_s28 = sand.u32 1, %s3482_s13   ;;  %p2845_p7 = scmp.lt.s32.totalorder %s2843_s3, %s2837_s17 }
 0x8c2   : > { %s2178_s14 = scalar_lea.hbm %s3484_s15, %s2445_s25  ;;  %s2167_s30 = scalar_lea.sflag [#allocation4], %s3485_s28 }
 0x8c3   : > { %p2846_p8 = por %p2845_p7, %p2844_p6 }
 0x8c5   : > { %p2847_p10 = pnand %p2846_p8, %p2840_p5 }
 0x8c7   : > { %2850 = shalt.err (!%p2847_p10)
}
 0x8c8   : > { %s2851_s23 = scalar_lea.hbm %s2178_s14, 128  ;;  %s2855_s27 = scalar_lea.hbm %s3484_s15, 256 }
 0x8c9   : > { %p2852_p11 = scmp.ne.s32.totalorder %s2178_s14, %s2851_s23  ;;  %p2856_p0 = scmp.lt.s32.totalorder %s2178_s14, %s3484_s15 }
 0x8ca   : > { %p2857_p1 = scmp.lt.s32.totalorder %s2855_s27, %s2851_s23 }
 0x8cb   : > { %p2853_p12 = pnand %p2852_p11, %p3048_p3 }
 0x8cc   : > { %p2858_p2 = por %p2857_p1, %p2856_p0 }
 0x8cd   : > { %p2854_p13 = pneg %p2853_p12 }
 0x8cf   : > { %p2859_p4 = pnand %p2858_p2, %p2854_p13 }
 0x8d1   : > { %2862 = shalt.err (!%p2859_p4)
}
 0x8d2   : > { %2708 = dma.vmem_to_hbm [thread:$0]  (%p3048_p3), %s2181_s26, 128, %s2178_s14, %s2167_s30  }
 0x8d3 PF: > { %s3486_s24 = sld [smem:[#allocation13_spill]] }
 0x8d4   : > { %s3487_s12 = sld [smem:[#allocation6_spill]] }
 0x8d9   : > { %p2714_p5 = scmp.ge.s32.totalorder %s3486_s24, 2 }
 0x8da   : > { %s2192_s25 = sand.u32 1, %s3487_s12  }
 0x8db   : > { %p2711_p6 = pnand %p2714_p5, %p3058_p9  ;;  %s2193_s20 = scalar_lea.sflag [#allocation4], %s2192_s25 }
 0x8dd   : > { %p2712_p7 = pneg %p2711_p6 }
 0x8df   : > { %2896 = dma.done.wait (%p2712_p7), %s2193_s20, 128  }
 0x8e0   : > { %2898 = vsyncadd (%p2712_p7), %s2193_s20, 4294967168  ;;  %s25_s28 = sadd.s32 1, %s3486_s24   ;;  %s3489_s21 = sld [smem:[#allocation7_spill]] }
 0x8e1   : > { %p22_p8 = scmp.ge.s32.totalorder %s25_s28, 6   ;;  %s3490_s22 = sld [smem:[#allocation8_spill]] }
 0x8e2   : > { %s3491_s23 = sld [smem:[#allocation18_spill]] }
 0x8e3   : > { %s3492_s24 = sld [smem:[#allocation11_spill]]  ;;  %24 = sbr.rel (!%p22_p8) target bundleno = 10 (0xa), region = 144 }
 0x8e4   : > { %s3493_s25 = sld [smem:[#allocation12_spill]] }
 0x8e5   : > { %s3494_s26 = sld [smem:[#allocation14_spill]] }
 0x8e6   : > { %s3495_s27 = sld [smem:[#allocation16_spill]] }
 0x8e8   :  { %2198 = vsyncpa [#allocation4], 1 }
 0x8e9   :  { %2200 = vsyncpa [#allocation4 + $0x1], 1 }

</bundles_post_ra>
